<compile_context>
chip_gen: v6e
topology: v6e:2x2x1
jax: 0.10.0
libtpu: 0.0.40
codegen_flags: <defaults>
</compile_context>

<pallas_src>
import jax
import jax.numpy as jnp
from jax.experimental import pallas as pl
from jax.experimental.pallas import tpu as pltpu


# ---------------------------------------------------------------------------
# Kernel
# ---------------------------------------------------------------------------
def attention_gate_kernel(g_ref, s_ref, wg_ref, ws_ref, b_ref, wo_ref, bo_ref,
                          out_ref):
    # g_ref: (Cg, T), s_ref: (Cs, T) -- spatial axis on lanes (lane-dense).
    g = g_ref[...].astype(jnp.float32)
    s = s_ref[...].astype(jnp.float32)

    # Channel contractions (tiny K) -> (Co, T); accumulate in f32.
    zg = jnp.dot(wg_ref[...], g, preferred_element_type=jnp.float32)
    zs = jnp.dot(ws_ref[...], s, preferred_element_type=jnp.float32)

    # Single fused bias (bg + bs), shape (Co, 1), broadcasts over lanes; ReLU.
    h = jnp.maximum(zg + zs + b_ref[...], 0.0)

    # Output conv (Co -> 1) + scalar bias from SMEM + sigmoid -> (1, T).
    a = jnp.dot(wo_ref[...], h, preferred_element_type=jnp.float32) + bo_ref[0, 0]
    attn = jax.nn.sigmoid(a)

    # Gate: broadcast attn over g's channels; lane-dense (Cg, T) store.
    out_ref[...] = (attn * g).astype(out_ref.dtype)


# ---------------------------------------------------------------------------
# Parameter prep (done once, outside the hot path)
# ---------------------------------------------------------------------------
def fold_bn(conv_w, conv_b, gamma, beta, mean, var, eps=1e-5):
    """Fold eval-mode BatchNorm into a 1x1 conv.  conv_w: (Cin, Cout)."""
    scale = gamma / jnp.sqrt(var + eps)                # (Cout,)
    w = conv_w * scale[None, :]                        # (Cin, Cout)
    b = (conv_b - mean) * scale + beta                 # (Cout,)
    return w, b


def prepare_gate_params(params):
    """Transpose weights for the (C, HW) layout and fuse the two BN biases."""
    co = params["wg"].shape[1]
    return {
        "wgT": params["wg"].T,                              # (Co, Cg)
        "wsT": params["ws"].T,                              # (Co, Cs)
        "woT": params["wo"].T,                              # (1, Co)
        "b_fused": (params["bg"] + params["bs"]).reshape(co, 1),   # (Co, 1)
        "bo": params["bo"].reshape(1, 1),                   # (1, 1) scalar
    }


# ---------------------------------------------------------------------------
# Wrapper
# ---------------------------------------------------------------------------
def _round_up(x, m):
    return ((x + m - 1) // m) * m


def _vmem_limit_for_tile(tile, io_itemsize):
    # Double-buffered g / s / out blocks (channel dims pad to 8 sublanes)
    # plus f32 intermediates (upcasts, zg, zs, h, attn).
    io_bytes = 2 * 3 * 8 * tile * io_itemsize
    tmp_bytes = 5 * 8 * tile * 4
    est = io_bytes + tmp_bytes
    return int(min(max(2 * est, 32 << 20), 96 << 20))


def attention_gate(g_nchw, s_nchw, prepped, tile_hw=32768,
                   vmem_limit_bytes=None):
    """out = sigmoid(conv1x1(relu(BN(conv(g)) + BN(conv(s))))) * g, NCHW in/out."""
    B, Cg, H, W = g_nchw.shape
    _, Cs, _, _ = s_nchw.shape
    HW = H * W

    # Native layout: (B, C, H*W) -- free reshape, no HBM transposes.
    g3 = g_nchw.reshape(B, Cg, HW)
    s3 = s_nchw.reshape(B, Cs, HW)

    # Lane tile: large (amortizes ~0.35us/step), multiple of 128, clamped to HW.
    tile = min(_round_up(tile_hw, 128), _round_up(HW, 128))
    n_tiles = pl.cdiv(HW, tile)            # ragged last block handled by Pallas

    if vmem_limit_bytes is None:
        vmem_limit_bytes = _vmem_limit_for_tile(
            tile, jnp.dtype(g_nchw.dtype).itemsize)

    wgT = prepped["wgT"]
    wsT = prepped["wsT"]
    woT = prepped["woT"]
    b_fused = prepped["b_fused"]
    bo = prepped["bo"]

    # Spatial-tile axis first so the leading "parallel" axis balances the two
    # TensorCores on v7x even when B is small.
    grid = (n_tiles, B)

    def const_spec(arr):
        return pl.BlockSpec(arr.shape, lambda i, b: (0, 0))

    out3 = pl.pallas_call(
        attention_gate_kernel,
        out_shape=jax.ShapeDtypeStruct((B, Cg, HW), g_nchw.dtype),
        grid_spec=pltpu.PrefetchScalarGridSpec(
            num_scalar_prefetch=0,
            grid=grid,
            in_specs=[
                pl.BlockSpec((pl.Squeezed(), Cg, tile), lambda i, b: (b, 0, i)),
                pl.BlockSpec((pl.Squeezed(), Cs, tile), lambda i, b: (b, 0, i)),
                const_spec(wgT),        # folded Wg conv+BN, transposed
                const_spec(wsT),        # folded Ws conv+BN, transposed
                const_spec(b_fused),    # bg + bs, (Co, 1)
                const_spec(woT),        # output conv weight, (1, Co)
                pl.BlockSpec(memory_space=pltpu.MemorySpace.SMEM),  # bo scalar
            ],
            out_specs=pl.BlockSpec((pl.Squeezed(), Cg, tile),
                                   lambda i, b: (b, 0, i)),
        ),
        compiler_params=pltpu.CompilerParams(
            dimension_semantics=("parallel", "parallel"),
            vmem_limit_bytes=vmem_limit_bytes),
    )(g3, s3, wgT, wsT, b_fused, woT, bo)

    # Output already has shape (B, Cg, HW) -- no pad to strip, just reshape.
    return out3.reshape(B, Cg, H, W)


# ---------------------------------------------------------------------------
# Plain-JAX reference + parameter construction
# ---------------------------------------------------------------------------
def reference(g_nchw, s_nchw, params):
    B, Cg, H, W = g_nchw.shape
    Cs = s_nchw.shape[1]
    g2d = jnp.transpose(g_nchw, (0, 2, 3, 1)).reshape(-1, Cg)
    s2d = jnp.transpose(s_nchw, (0, 2, 3, 1)).reshape(-1, Cs)
    zg = g2d @ params["wg"] + params["bg"]
    zs = s2d @ params["ws"] + params["bs"]
    h = jnp.maximum(zg + zs, 0.0)
    attn = jax.nn.sigmoid(h @ params["wo"] + params["bo"])
    out = attn * g2d
    return jnp.transpose(out.reshape(B, H, W, Cg), (0, 3, 1, 2))


def make_params(key, in_c, out_c):
    kCg, kCs = in_c
    ks = jax.random.split(key, 12)

    def u(k, shape, scale=0.2):
        return jax.random.uniform(k, shape, jnp.float32, -scale, scale)

    # Raw conv weights (Cin, Cout) and biases, plus BN params.
    wg_raw, bg_raw = u(ks[0], (kCg, out_c)), u(ks[1], (out_c,))
    ws_raw, bs_raw = u(ks[2], (kCs, out_c)), u(ks[3], (out_c,))
    wo_raw, bo_raw = u(ks[4], (out_c, 1)), u(ks[5], (1,))

    gamma_g = 1.0 + u(ks[6], (out_c,), 0.1)
    beta_g = u(ks[7], (out_c,), 0.1)
    mean_g = u(ks[8], (out_c,), 0.1)
    var_g = 1.0 + u(ks[9], (out_c,), 0.1) ** 2

    gamma_s = 1.0 + u(ks[10], (out_c,), 0.1)
    beta_s = u(ks[11], (out_c,), 0.1)
    mean_s = jnp.zeros((out_c,), jnp.float32)
    var_s = jnp.ones((out_c,), jnp.float32)

    wg, bg = fold_bn(wg_raw, bg_raw, gamma_g, beta_g, mean_g, var_g)
    ws, bs = fold_bn(ws_raw, bs_raw, gamma_s, beta_s, mean_s, var_s)

    return {"wg": wg, "bg": bg, "ws": ws, "bs": bs, "wo": wo_raw, "bo": bo_raw}


# ---------------------------------------------------------------------------
# Main
# ---------------------------------------------------------------------------
if __name__ == "__main__":
    key = jax.random.PRNGKey(0)
    k_g, k_s, k_p, k_g2, k_s2, k_p2 = jax.random.split(key, 6)

    # Case 1: tile-aligned spatial size (HW = 256 fits one 256-lane tile).
    B, H, W = 2, 16, 16
    in_c, out_c = (4, 6), 8
    g = jax.random.normal(k_g, (B, in_c[0], H, W), jnp.float32)
    s = jax.random.normal(k_s, (B, in_c[1], H, W), jnp.float32)
    params = make_params(k_p, in_c, out_c)
    prepped = prepare_gate_params(params)

    out = jax.block_until_ready(attention_gate(g, s, prepped))
    ref = reference(g, s, params)
    assert out.shape == (B, in_c[0], H, W)
    assert jnp.allclose(out, ref, atol=1e-5, rtol=1e-5), "case1 mismatch"

    # Case 2: ragged spatial size (HW = 169, tile = 128 -> masked tail block).
    B2, H2, W2 = 2, 13, 13
    in_c2, out_c2 = (3, 5), 4
    g2 = jax.random.normal(k_g2, (B2, in_c2[0], H2, W2), jnp.float32)
    s2 = jax.random.normal(k_s2, (B2, in_c2[1], H2, W2), jnp.float32)
    params2 = make_params(k_p2, in_c2, out_c2)
    prepped2 = prepare_gate_params(params2)

    out2 = jax.block_until_ready(
        attention_gate(g2, s2, prepped2, tile_hw=128))
    ref2 = reference(g2, s2, params2)
    assert out2.shape == (B2, in_c2[0], H2, W2)
    assert jnp.allclose(out2, ref2, atol=1e-5, rtol=1e-5), "case2 mismatch"

    print("KERNEL_OK")
</pallas_src>

<mosaic_0001>
module attributes {stable_mosaic.version = 11 : i64} {
  func.func @attention_gate_kernel(%arg0: i32, %arg1: i32, %arg2: memref<1x4x256xf32, #tpu.memory_space<vmem>>, %arg3: memref<1x6x256xf32, #tpu.memory_space<vmem>>, %arg4: memref<8x4xf32, #tpu.memory_space<vmem>>, %arg5: memref<8x6xf32, #tpu.memory_space<vmem>>, %arg6: memref<8x1xf32, #tpu.memory_space<vmem>>, %arg7: memref<1x8xf32, #tpu.memory_space<vmem>>, %arg8: memref<1x1xf32, #tpu.memory_space<smem>>, %arg9: memref<1x4x256xf32, #tpu.memory_space<vmem>>) attributes {dimension_semantics = [#tpu.dimension_semantics<parallel>, #tpu.dimension_semantics<parallel>], iteration_bounds = array<i64: 1, 2>, scalar_prefetch = 0 : i64, scratch_operands = 0 : i64, tpu.core_type = #tpu.core_type<tc>, window_params = [{transform_indices = @transform_0, window_bounds = array<i64: 1, 4, 256>}, {transform_indices = @transform_1, window_bounds = array<i64: 1, 6, 256>}, {pipeline_mode = #tpu.pipeline_mode<synchronous>, transform_indices = @transform_2, window_bounds = array<i64: 8, 4>}, {pipeline_mode = #tpu.pipeline_mode<synchronous>, transform_indices = @transform_3, window_bounds = array<i64: 8, 6>}, {pipeline_mode = #tpu.pipeline_mode<synchronous>, transform_indices = @transform_4, window_bounds = array<i64: 8, 1>}, {pipeline_mode = #tpu.pipeline_mode<synchronous>, transform_indices = @transform_5, window_bounds = array<i64: 1, 8>}, {transform_indices = @transform_6, window_bounds = array<i64: 1, 1>}, {transform_indices = @transform_7, window_bounds = array<i64: 1, 4, 256>}]} {
    %c0 = arith.constant 0 : index
    %c0_0 = arith.constant 0 : index
    %c0_1 = arith.constant 0 : index
    %0 = vector.load %arg2[%c0, %c0_0, %c0_1] : memref<1x4x256xf32, #tpu.memory_space<vmem>>, vector<1x4x256xf32>
    %1 = vector.shape_cast %0 : vector<1x4x256xf32> to vector<4x256xf32>
    %c0_2 = arith.constant 0 : index
    %c0_3 = arith.constant 0 : index
    %c0_4 = arith.constant 0 : index
    %2 = vector.load %arg3[%c0_2, %c0_3, %c0_4] : memref<1x6x256xf32, #tpu.memory_space<vmem>>, vector<1x6x256xf32>
    %3 = vector.shape_cast %2 : vector<1x6x256xf32> to vector<6x256xf32>
    %c0_5 = arith.constant 0 : index
    %c0_6 = arith.constant 0 : index
    %4 = vector.load %arg4[%c0_5, %c0_6] : memref<8x4xf32, #tpu.memory_space<vmem>>, vector<8x4xf32>
    %cst = arith.constant dense<0.000000e+00> : vector<8x256xf32>
    %5 = tpu.matmul %4, %1, %cst {dimension_numbers = #tpu.dot_dimension_numbers<[1], [0], [0], [1], [0, 0, 1, 1], [], []>} : vector<8x4xf32>, vector<4x256xf32>, vector<8x256xf32> -> vector<8x256xf32>
    %c0_7 = arith.constant 0 : index
    %c0_8 = arith.constant 0 : index
    %6 = vector.load %arg5[%c0_7, %c0_8] : memref<8x6xf32, #tpu.memory_space<vmem>>, vector<8x6xf32>
    %cst_9 = arith.constant dense<0.000000e+00> : vector<8x256xf32>
    %7 = tpu.matmul %6, %3, %cst_9 {dimension_numbers = #tpu.dot_dimension_numbers<[1], [0], [0], [1], [0, 0, 1, 1], [], []>} : vector<8x6xf32>, vector<6x256xf32>, vector<8x256xf32> -> vector<8x256xf32>
    %8 = arith.addf %5, %7 : vector<8x256xf32>
    %c0_10 = arith.constant 0 : index
    %c0_11 = arith.constant 0 : index
    %9 = vector.load %arg6[%c0_10, %c0_11] : memref<8x1xf32, #tpu.memory_space<vmem>>, vector<8x1xf32>
    %10 = vector.broadcast %9 : vector<8x1xf32> to vector<8x256xf32>
    %11 = arith.addf %8, %10 : vector<8x256xf32>
    %cst_12 = arith.constant 0.000000e+00 : f32
    %12 = vector.broadcast %cst_12 : f32 to vector<8x256xf32>
    %13 = arith.maximumf %11, %12 : vector<8x256xf32>
    %c0_13 = arith.constant 0 : index
    %c0_14 = arith.constant 0 : index
    %14 = vector.load %arg7[%c0_13, %c0_14] : memref<1x8xf32, #tpu.memory_space<vmem>>, vector<1x8xf32>
    %cst_15 = arith.constant dense<0.000000e+00> : vector<1x256xf32>
    %15 = tpu.matmul %14, %13, %cst_15 {dimension_numbers = #tpu.dot_dimension_numbers<[1], [0], [0], [1], [0, 0, 1, 1], [], []>} : vector<1x8xf32>, vector<8x256xf32>, vector<1x256xf32> -> vector<1x256xf32>
    %c0_16 = arith.constant 0 : index
    %c0_17 = arith.constant 0 : index
    %16 = memref.load %arg8[%c0_16, %c0_17] : memref<1x1xf32, #tpu.memory_space<smem>>
    %17 = vector.broadcast %16 : f32 to vector<1x256xf32>
    %18 = arith.addf %15, %17 : vector<1x256xf32>
    %19 = arith.negf %18 : vector<1x256xf32>
    %20 = math.exp %19 : vector<1x256xf32>
    %cst_18 = arith.constant 1.000000e+00 : f32
    %21 = vector.broadcast %cst_18 : f32 to vector<1x256xf32>
    %22 = arith.addf %21, %20 : vector<1x256xf32>
    %23 = arith.divf %21, %22 : vector<1x256xf32>
    %24 = vector.broadcast %23 : vector<1x256xf32> to vector<4x256xf32>
    %25 = arith.mulf %24, %1 : vector<4x256xf32>
    %c0_19 = arith.constant 0 : index
    %c0_20 = arith.constant 0 : index
    %c0_21 = arith.constant 0 : index
    %26 = vector.load %arg9[%c0_19, %c0_20, %c0_21] : memref<1x4x256xf32, #tpu.memory_space<vmem>>, vector<1x4x256xf32>
    %27 = vector.shape_cast %26 : vector<1x4x256xf32> to vector<4x256xf32>
    %28 = vector.shape_cast %25 : vector<4x256xf32> to vector<1x4x256xf32>
    tpu.vector_store %arg9[%c0_19, %c0_20, %c0_21], %28 {strides = array<i32>} : memref<1x4x256xf32, #tpu.memory_space<vmem>>, vector<1x4x256xf32>,
    return
  }
  func.func @transform_0(%arg0: i32, %arg1: i32) -> (i32, i32, i32) {
    %c0_i32 = arith.constant 0 : i32
    %c0_i32_0 = arith.constant 0 : i32
    return %arg1, %c0_i32, %arg0 : i32, i32, i32
  }
  func.func @transform_1(%arg0: i32, %arg1: i32) -> (i32, i32, i32) {
    %c0_i32 = arith.constant 0 : i32
    %c0_i32_0 = arith.constant 0 : i32
    return %arg1, %c0_i32, %arg0 : i32, i32, i32
  }
  func.func @transform_2(%arg0: i32, %arg1: i32) -> (i32, i32) {
    %c0_i32 = arith.constant 0 : i32
    %c0_i32_0 = arith.constant 0 : i32
    %c0_i32_1 = arith.constant 0 : i32
    return %c0_i32, %c0_i32_0 : i32, i32
  }
  func.func @transform_3(%arg0: i32, %arg1: i32) -> (i32, i32) {
    %c0_i32 = arith.constant 0 : i32
    %c0_i32_0 = arith.constant 0 : i32
    %c0_i32_1 = arith.constant 0 : i32
    return %c0_i32, %c0_i32_0 : i32, i32
  }
  func.func @transform_4(%arg0: i32, %arg1: i32) -> (i32, i32) {
    %c0_i32 = arith.constant 0 : i32
    %c0_i32_0 = arith.constant 0 : i32
    %c0_i32_1 = arith.constant 0 : i32
    return %c0_i32, %c0_i32_0 : i32, i32
  }
  func.func @transform_5(%arg0: i32, %arg1: i32) -> (i32, i32) {
    %c0_i32 = arith.constant 0 : i32
    %c0_i32_0 = arith.constant 0 : i32
    %c0_i32_1 = arith.constant 0 : i32
    return %c0_i32, %c0_i32_0 : i32, i32
  }
  func.func @transform_6(%arg0: i32, %arg1: i32) -> (i32, i32) {
    %c0_i32 = arith.constant 0 : i32
    %c0_i32_0 = arith.constant 0 : i32
    %c0_i32_1 = arith.constant 0 : i32
    return %c0_i32, %c0_i32_0 : i32, i32
  }
  func.func @transform_7(%arg0: i32, %arg1: i32) -> (i32, i32, i32) {
    %c0_i32 = arith.constant 0 : i32
    %c0_i32_0 = arith.constant 0 : i32
    return %arg1, %c0_i32, %arg0 : i32, i32, i32
  }
}

</mosaic_0001>

<bundles_post_ra>
// kernel: tpu_custom_call.1
= control target key start
LH: loop header
LB: loop body
LE: loop exit
PB: predicated region body
PF: predicated region fallthrough
CT: control target
= control target key end

     0   :  { %s1073_s0 = inlined_call_operand.vmem [shape: f32[2,4,256], index: 0, kind: input, shape index: {}]   ;;  %s1074_s1 = inlined_call_operand.vmem [shape: f32[2,6,256], index: 1, kind: input, shape index: {}]   ;;  %s1075_s2 = inlined_call_operand.vmem [shape: f32[8,4], index: 2, kind: input, shape index: {}]   ;;  %s1076_s3 = inlined_call_operand.vmem [shape: f32[8,6], index: 3, kind: input, shape index: {}]   ;;  %s1077_s4 = inlined_call_operand.vmem [shape: f32[8,1], index: 4, kind: input, shape index: {}]   ;;  %s1078_s5 = inlined_call_operand.vmem [shape: f32[1,8], index: 5, kind: input, shape index: {}]   ;;  %s1079_s6 = inlined_call_operand.<no memory space> [shape: f32[1,1], index: 6, kind: input, shape index: {}]   ;;  %s1080_s7 = inlined_call_operand.hbm [shape: f32[2,4,256], index: 7, kind: output, shape index: {}]  }
   0x1   :  { %12 = sst [smem:[#allocation2]] %s1079_s6 }
   0x2   :  { %13 = vsyncpa [#allocation4], 0 }
   0x3   :  { %15 = vsyncpa [#allocation4 + $0x1], 0  ;;  %s959_s26 = smov 0   ;;  %s961_s27 = smov 0  }
   0x4   :  { %s963_s28 = smov 0   ;;  %s965_s29 = smov 0  }
   0x5   :  { %s967_s30 = smov 0   ;;  %s969_s8 = smov 0  }
   0x6 LB: > { %s741_s6 = sadd.s32 4294967295, %s911_s8   ;;  %s742_s9 = sadd.s32 4294967294, %s911_s8   ;;  %s911_s8 = sphi %s969_s8, %s21_s8   ;;  %s907_s30 = sphi %s967_s30, %s1087_s30   ;;  %s903_s29 = sphi %s965_s29, %s1086_s29   ;;  %s899_s28 = sphi %s963_s28, %s1085_s28   ;;  %s895_s27 = sphi %s961_s27, %s1084_s27   ;;  %s891_s26 = sphi %s959_s26, %s1083_s26  }
   0x7   : > { %s30_s10 = sadd.s32 1, %s907_s30  ;;  %s203_s11 = sadd.s32 1, %s899_s28 }
   0x8   : > { %p31_p0 = scmp.ge.s32.totalorder %s30_s10, 2  ;;  %p213_p1 = scmp.ne.s32.totalorder %s899_s28, %s895_s27 }
   0x9   : > { %p214_p2 = scmp.eq.s32.totalorder %s741_s6, 1  ;;  %p219_p3 = scmp.ne.s32.totalorder %s895_s27, %s891_s26 }
   0xa   : > { %s1089_s10 = smov (%p31_p0, %s30_s10), 0  ;;  %p220_p5 = scmp.eq.s32.totalorder %s742_s9, 1 }
   0xb   : > { %p999_p4 = por %p214_p2, %p213_p1  ;;  %s198_s13 = ssub.s32 %s907_s30, %s1089_s10 }
   0xc   : > { %p745_p6 = scmp.ge.s32.totalorder %s911_s8, 1  ;;  %p201_p7 = scmp.eq.s32.totalorder %s198_s13, 0 }
   0xd   : > { %p1006_p8 = por %p220_p5, %p219_p3  ;;  %p279_p9 = scmp.lt.s32.totalorder %s911_s8, 3 }
   0xe   : > { %s1012_s15 = scalar_select %p201_p7, %s899_s28, %s203_s11  }
   0xf   : > { %p280_p10 = pnand %p745_p6, %p279_p9 }
  0x10   : > { %p325_p11 = scmp.lt.s32.totalorder (!%p280_p10), %s903_s29, 1  ;;  %s767_s22 = sshll.u32 (!%p280_p10), %s903_s29, 7 }
  0x11   : > { %283 = sbr.rel (%p280_p10) target bundleno = 483 (0x1e3), region = 48  ;;  %s645_s9 = scalar_lea.hbm (!%p280_p10), %s1080_s7, %s767_s22 }
  0x12   : > { %s915_s16 = smov (!%p280_p10), [#allocation3]  }
  0x13   : > { %s839_s17 = sshll.u32 (!%p280_p10), %s915_s16, 4  ;;  %s840_s17 = int_to_ptr.vmem [resolvable:$false] %s839_s17 }
  0x16   : > { %v913_v0 = vmov 0.0   ;;  %v514_v1 = vld [vmem:[%s1077_s4] sm:$0xff]  ;;  %s326_s18 = scalar_select %p325_p11, %s903_s29, 1  ;;  %v914_v2 = vmov 0   ;;  %vm354_vm0 = vcmask 1045504   ;;  %vm350_vm1 = vcmask 48128  }
  0x17   : > { %425 = vmatprep.mubr.f32.mxu0 %v913_v0  ;;  %507 = vmatprep.mubr.f32.mxu1 %v913_v0  ;;  %v349_v3 = vld [vmem:[%s1076_s3] sm:$0xff]  ;;  %vm438_vm2 = vcmask 1043456   ;;  %vm434_vm3 = vcmask 31744   ;;  %vm527_vm4 = vcmask 64512   ;;  %v614_v32 = vlaneseq  ;;  %s841_s29 = scalar_lea.vmem %s840_s17, 256 }
  0x18   : > { %825 = vset.pattern.permute.xlu0 %v914_v2  ;;  %s766_s19 = sshll.u32 %s326_s18, 4  ;;  %s765_s20 = sshll.u32 %s326_s18, 3  ;;  %v348_v8 = vld [vmem:[%s1075_s2] sm:$0xff] }
  0x19   : > { %517 = vperm.xlu0 %825, %v514_v1   ;;  %s342_s23 = scalar_lea.vmem %s1074_s1, %s766_s19  ;;  %s332_s11 = scalar_lea.vmem %s1073_s0, %s765_s20  ;;  %v524_v20 = vld [vmem:[%s1078_s5] sm:$0x1]  ;;  %v615_v33 = vshrl.u32 %v614_v32, 7 }
  0x1a   : > { %v347_v4 = vld [vmem:[%s342_s23 + $0x8] sm:$0x3f]  ;;  %v346_v5 = vld [vmem:[%s342_s23] sm:$0x3f]  ;;  %s525_s19 = sld [smem:[#allocation2]]  ;;  %s321_s20 = sand.u32 1, %s895_s27  }
  0x1b   : > { %v345_v6 = vld [vmem:[%s332_s11] sm:$0xff]  ;;  %751 = vmatprep.subr.msk.mxu0 %vm354_vm0, %v347_v4  ;;  %v616_v34 = vsub.s32 0, %v615_v33  ;;  %s746_s21 = sshll.u32 %s321_s20, 3  ;;  %s631_s11 = scalar_lea.sflag [#allocation4], %s321_s20 }
  0x1c   : > { %v433_v7 = vcombine.high %v345_v6, %v345_v6  ;;  %752 = vmatpush1.msk.msra.mxu0 %vm354_vm0, %v346_v5  ;;  %s323_s23 = scalar_lea.vmem [#allocation3], %s746_s21 }
  0x1d   : > { %753 = vmatmul.mubr.msk.f32.vlgmr.msra.gmra.mxu0 %vm350_vm1, %v349_v3  ;;  %s647_s24 = sshll.u32 %s323_s23, 4  ;;  %s648_s24 = int_to_ptr.vmem [resolvable:$true] %s647_s24 }
  0x1e   : > { %754 = vmatprep.subr.msk.mxu1 %vm438_vm2, %v433_v7  ;;  %595 = vmatprep.mubr.f32.mxu0 %v913_v0  ;;  %s835_s13 = scalar_lea.vmem %s648_s24, 128  ;;  %p842_p1 = scmp.lt.s32.totalorder %s648_s24, %s840_s17 }
  0x1f   : > { %755 = vmatpush1.msk.msra.mxu1 %vm438_vm2, %v345_v6  ;;  %p836_p12 = scmp.ne.s32.totalorder %s648_s24, %s835_s13  ;;  %p843_p2 = scmp.lt.s32.totalorder %s841_s29, %s835_s13 }
  0x20   : > { %756 = vmatmul.mubr.msk.f32.vlgmr.msra.gmra.mxu1 %vm434_vm3, %v348_v8  ;;  %v526_v21 = vstv %s525_s19 }
  0x21   : > { %p837_p13 = pnand %p836_p12, %p999_p4  ;;  %p844_p3 = por %p843_p2, %p842_p1 }
  0x23   : > { %p838_p0 = pneg %p837_p13 }
  0x25   : > { %p845_p5 = pnand %p844_p3, %p838_p0 }
  0x94   : > { %v518_v12 = vpop.permute.xlu0 %517 }
  0xdd   : > { %v427_v9 = vpop.f32.mrf.mxu0 }
  0xdf   : > { %v429_v13 = vpop.f32.mrf.mxu0 }
  0xe0   : > { %v509_v10 = vpop.f32.mrf.mxu1 }
  0xe1   : > { %v510_v11 = vadd.f32 %v509_v10, %v427_v9 }
  0xe2   : > { %v511_v14 = vpop.f32.mrf.mxu1 }
  0xe3   : > { %v512_v15 = vadd.f32 %v511_v14, %v429_v13  ;;  %v520_v16 = vadd.f32 %v518_v12, %v510_v11 }
  0xe5   : > { %v521_v17 = vadd.f32 %v518_v12, %v512_v15  ;;  %v522_v19 = vmax.f32 %v520_v16, 0.0 }
  0xe7   : > { %v523_v18 = vmax.f32 %v521_v17, 0.0 }
  0xe9   : > { %561 = vmatprep.subr.mxu0 %v523_v18 }
  0xea   : > { %562 = vmatpush1.msra.mxu0 %v522_v19 }
  0xeb   : > { %757 = vmatmul.mubr.msk.f32.vlgmr.msra.gmra.mxu0 %vm527_vm4, %v524_v20 }
 0x1ab   : > { %v597_v22 = vpop.f32.mrf.mxu0 }
 0x1ac   : > { %v598_v23 = vadd.f32 %v597_v22, %v526_v21 }
 0x1ad   : > { %v599_v24 = vpop.f32.mrf.mxu0 }
 0x1ae   : > { %v758_v25 = vmul.f32 -1.442695, %v598_v23  ;;  %v600_v26 = vadd.f32 %v599_v24, %v526_v21 }
 0x1b0   : > { %827 = vpow2.f32 %v758_v25  ;;  %v759_v27 = vmul.f32 -1.442695, %v600_v26 }
 0x1b2   : > { %829 = vpow2.f32 %v759_v27 }
 0x1bd   : > { %v828_v28 = vpop.eup %827 }
 0x1be   : > { %v608_v29 = vadd.f32 1.0, %v828_v28 }
 0x1bf   : > { %v830_v30 = vpop.eup %829 }
 0x1c0   : > { %831 = vrcp.f32 %v608_v29  ;;  %v609_v31 = vadd.f32 1.0, %v830_v30 }
 0x1c2   : > { %833 = vrcp.f32 %v609_v31 }
 0x1cd   : > { %v832_v35 = vpop.eup %831 }
 0x1ce   : > { %v617_v36 = vrot.slane %v832_v35, %v616_v34 }
 0x1cf   : > { %v834_v37 = vpop.eup %833 }
 0x1d0   : > { %v621_v38 = vrot.slane %v834_v37, %v616_v34  ;;  %v623_v39 = vmul.f32 %v617_v36, %v345_v6 }
 0x1d2   : > { %v624_v40 = vmul.f32 %v621_v38, %v433_v7 }
 0x1d4   : > { %v627_v41 = vcombine.low %v623_v39, %v624_v40 }
 0x1d6   : > { %629 = vst [vmem:[%s323_s23] sm:$0xff] %v627_v41 }
 0x1d7   : > { %848 = shalt.err (!%p845_p5)
}
 0x1d8   : > { %s849_s18 = scalar_lea.hbm %s645_s9, 128  ;;  %s853_s21 = scalar_lea.hbm %s1080_s7, 256 }
 0x1d9   : > { %p850_p6 = scmp.ne.s32.totalorder %s645_s9, %s849_s18  ;;  %p854_p10 = scmp.lt.s32.totalorder %s645_s9, %s1080_s7 }
 0x1da   : > { %p855_p11 = scmp.lt.s32.totalorder %s853_s21, %s849_s18 }
 0x1db   : > { %p851_p7 = pnand %p850_p6, %p999_p4 }
 0x1dc   : > { %p856_p12 = por %p855_p11, %p854_p10 }
 0x1dd   : > { %p852_p9 = pneg %p851_p7 }
 0x1df   : > { %p857_p13 = pnand %p856_p12, %p852_p9 }
 0x1e1   : > { %860 = shalt.err (!%p857_p13)
}
 0x1e2   : > { %768 = dma.vmem_to_hbm [thread:$0]  (%p999_p4), %s648_s24, 128, %s645_s9, %s631_s11  }
 0x1e3 PF: > { %p774_p0 = scmp.ge.s32.totalorder %s911_s8, 2  ;;  %s659_s25 = sand.u32 1, %s891_s26  }
 0x1e4   : > { %s660_s6 = scalar_lea.sflag [#allocation4], %s659_s25 }
 0x1e5   : > { %p771_p1 = pnand %p774_p0, %p1006_p8 }
 0x1e7   : > { %p772_p2 = pneg %p771_p1 }
 0x1e9   : > { %886 = dma.done.wait (%p772_p2), %s660_s6, 128  }
 0x1ea   : > { %888 = vsyncadd (%p772_p2), %s660_s6, 4294967168  ;;  %s21_s8 = sadd.s32 1, %s911_s8   ;;  %s1083_s26 = smov %s895_s27 }
 0x1eb   : > { %p18_p3 = scmp.ge.s32.totalorder %s21_s8, 4   ;;  %s1084_s27 = smov %s899_s28 }
 0x1ec   : > { %s1085_s28 = smov %s1012_s15  ;;  %s1086_s29 = smov %s907_s30 }
 0x1ed   : > { %s1087_s30 = smov %s1089_s10  ;;  %20 = sbr.rel (!%p18_p3) target bundleno = 6 (0x6), region = 86 }
 0x1f2   :  { %665 = vsyncpa [#allocation4], 1 }
 0x1f3   :  { %667 = vsyncpa [#allocation4 + $0x1], 1 }

</bundles_post_ra>
